<compile_context>
chip_gen: v6e
topology: v6e:2x2x1
jax: 0.10.0
libtpu: 0.0.40
codegen_flags: <defaults>
</compile_context>

<pallas_src>
import functools

import jax
import jax.numpy as jnp
from jax import lax
from jax.experimental import pallas as pl
from jax.experimental.pallas import tpu as pltpu


def _cel_kernel(threshold, logits_ref, cwT_ref, meta_ref, part_ref, next_ref):
    logits = logits_ref[...].astype(jnp.float32)                  # (TN, C)
    tn, c = logits.shape
    n_super = cwT_ref.shape[1]

    meta = meta_ref[...]                                          # (TN, 2) i32
    tt = meta[:, 0:1]                                             # (TN, 1)
    prev_i = meta[:, 1:2]                                         # (TN, 1)

    # ---- logsumexp pieces: one exp per element, one log per row ----------
    m = jnp.max(logits, axis=1, keepdims=True)                    # (TN, 1)
    shifted = logits - m                                          # (TN, C)
    exps = jnp.exp(shifted)                                       # (TN, C)
    sumexp = jnp.sum(exps, axis=1, keepdims=True)                 # (TN, 1)
    log_z = jnp.log(sumexp)                                       # (TN, 1)

    # entropy = log_z - sum(exps*shifted)/sumexp
    # entropy < t   <=>   (log_z - t) * sumexp < sum(exps*shifted)
    ent_num = jnp.sum(exps * shifted, axis=1, keepdims=True)      # (TN, 1)
    passed = (log_z - threshold) * sumexp < ent_num               # bool (TN,1)

    prev_b = prev_i != 0
    curr_check = 1.0 - prev_i.astype(jnp.float32)                 # (TN, 1)
    # TODO(synk): next_passed could be emitted lane-dense ((1, tn) blocks) to
    # avoid masked vst; kept (tn, 1) to avoid an in-kernel sublane->lane
    # relayout — the store is tiny relative to the exp pipeline.
    next_ref[...] = jnp.logical_or(passed, prev_b).astype(jnp.int32)

    # ---- argmax over classes: shifted == 0.0 exactly at the row max -------
    col = lax.broadcasted_iota(jnp.int32, (tn, c), 1)             # (TN, C)
    pred_idx = jnp.min(jnp.where(shifted == 0.0, col, c),
                       axis=1, keepdims=True)                     # (TN, 1)
    onehot_pred = (col == pred_idx).astype(jnp.float32)           # (TN, C)

    # w2[i] = class_weights[truetarget[i], predtarget[i]]
    # contracted over C on the MXU; only a (TN, S) result is popped.
    t_sel = jnp.dot(onehot_pred, cwT_ref[...],
                    preferred_element_type=jnp.float32)           # (TN, S)
    scol = lax.broadcasted_iota(jnp.int32, (tn, n_super), 1)      # (TN, S)
    w2 = jnp.sum(jnp.where(scol == tt, t_sel, 0.0),
                 axis=1, keepdims=True)                           # (TN, 1)

    iw = w2 * curr_check                                          # (TN, 1)

    # logp_true[i] = log_softmax(logits)[i, truetarget[i]]  (no f32 one-hot)
    logp_true = jnp.sum(jnp.where(col == tt, shifted, 0.0),
                        axis=1, keepdims=True) - log_z            # (TN, 1)
    l2 = -iw * logp_true                                          # (TN, 1)

    # ---- per-tile partial sums -> lane-dense (1,1,128) output block -------
    s_l2 = jnp.sum(l2)
    s_iw = jnp.sum(iw)
    s_cc = jnp.sum(curr_check)
    lane = lax.broadcasted_iota(jnp.int32, (1, 1, 128), 2)
    part_ref[...] = jnp.where(
        lane == 0, s_l2,
        jnp.where(lane == 1, s_iw,
                  jnp.where(lane == 2, s_cc, 0.0)))


def _vmem_capacity_bytes():
    try:
        info = pltpu.get_tpu_info()
        for attr in ("vmem_capacity_bytes", "vmem_size_bytes", "vmem_bytes"):
            v = getattr(info, attr, None)
            if v:
                return int(v)
    except Exception:
        pass
    return 128 * 1024 * 1024


def _tile_plan(n, c, in_itemsize):
    """Row-tile size + VMEM limit, generation-aware.

    128 MiB parts (v5e/v6e): big tile budget; v7x (64 MiB physical /
    32 MiB scoped): keep the conservative budget.
    """
    cap = _vmem_capacity_bytes()
    if cap >= 100 * 1024 * 1024:           # v5e / v6e
        budget = 56 * 1024 * 1024
        vmem_limit = 96 * 1024 * 1024
    else:                                  # v7x
        budget = 20 * 1024 * 1024
        vmem_limit = 32 * 1024 * 1024

    # sublane packing of the input dtype: f32 -> 8, bf16 -> 16, int8/fp8 -> 32
    pack = max(8, 32 // max(in_itemsize, 1))
    # 2 double-buffered native-dtype logits blocks + ~6 live f32 (TN,C) temps
    per_row = c * (2 * in_itemsize + 6 * 4) + 32
    tn = budget // max(per_row, 1)
    tn = max(pack, min(8192, (tn // pack) * pack))
    n_padp = -(-n // pack) * pack
    return min(tn, n_padp), vmem_limit


def cost_adjusted_cel_samples(logits, target, prev_passed,
                              class_weights, super_classes, threshold):
    """JAX wrapper mirroring CostAdjustedCrossEntropyLossSamples.forward."""
    n, c = logits.shape
    cw_t = jnp.transpose(class_weights.astype(jnp.float32))       # (C, S)
    n_super = cw_t.shape[1]

    # tiny N-length gather (module glue); everything per-element is in-kernel
    truetarget = super_classes[target].astype(jnp.int32)          # (N,)

    tn, vmem_limit = _tile_plan(n, c, logits.dtype.itemsize)
    grid_n = -(-n // tn)
    n_pad = grid_n * tn
    pad = n_pad - n

    # Pad rows: mark them "already passed" so they contribute 0 to all sums.
    tt_p = jnp.pad(truetarget.reshape(n, 1), ((0, pad), (0, 0)))
    prev_p = jnp.pad(prev_passed.astype(jnp.int32).reshape(n, 1),
                     ((0, pad), (0, 0)), constant_values=1)
    meta = jnp.concatenate([tt_p, prev_p], axis=1)                # (n_pad, 2)
    logits_p = jnp.pad(logits, ((0, pad), (0, 0)))

    kernel = functools.partial(_cel_kernel, float(threshold))
    cost = pl.CostEstimate(
        flops=int(9 * n_pad * c + 2 * n_pad * c * n_super),
        transcendentals=int(n_pad * c + n_pad),
        bytes_accessed=int(n_pad * c * logits.dtype.itemsize
                           + c * n_super * 4 + 3 * n_pad * 4
                           + grid_n * 128 * 4),
    )

    partials, next_i = pl.pallas_call(
        kernel,
        out_shape=(jax.ShapeDtypeStruct((grid_n, 1, 128), jnp.float32),
                   jax.ShapeDtypeStruct((n_pad, 1), jnp.int32)),
        grid_spec=pltpu.PrefetchScalarGridSpec(
            num_scalar_prefetch=0,
            grid=(grid_n,),
            in_specs=[pl.BlockSpec((tn, c), lambda i: (i, 0)),        # logits
                      pl.BlockSpec((c, n_super), lambda i: (0, 0)),   # cw^T
                      pl.BlockSpec((tn, 2), lambda i: (i, 0))],       # [tt|prev]
            out_specs=(pl.BlockSpec((1, 1, 128), lambda i: (i, 0, 0)),  # partials
                       pl.BlockSpec((tn, 1), lambda i: (i, 0)))),       # next
        compiler_params=pltpu.CompilerParams(
            dimension_semantics=("parallel",),       # megacore-shardable rows
            vmem_limit_bytes=vmem_limit),
        cost_estimate=cost,
    )(logits_p, cw_t, meta)

    # Final reduce + divide on the host-side XLA graph (tiny).
    psum = jnp.sum(partials, axis=(0, 1))                         # (128,)
    s_l2, s_iw, s_cc = psum[0], psum[1], psum[2]
    # If every sample already passed, the module returns 0.
    loss = jnp.where(s_cc == 0.0, jnp.float32(0.0), s_l2 / s_iw)
    return loss, next_i[:n, 0].astype(jnp.bool_)


def _reference(logits, target, prev_passed, class_weights, super_classes,
               threshold):
    n = logits.shape[0]
    logp = jax.nn.log_softmax(logits.astype(jnp.float32), axis=1)
    p = jax.nn.softmax(logits.astype(jnp.float32), axis=1)
    entropy = -jnp.sum(p * logp, axis=1)
    passed = entropy < threshold
    curr_check = (~prev_passed).astype(jnp.float32)
    next_passed = jnp.logical_or(passed, prev_passed)
    truetarget = super_classes[target].astype(jnp.int32)
    predtarget = jnp.argmax(logp, axis=1)
    w1 = class_weights[truetarget]
    w2 = w1[jnp.arange(n), predtarget]
    iw = w2 * curr_check
    l2 = -iw * logp[jnp.arange(n), truetarget]
    l3 = jnp.where(jnp.sum(curr_check) == 0.0, 0.0,
                   jnp.sum(l2) / jnp.sum(iw))
    return l3, next_passed


if __name__ == "__main__":
    N, C = 12, 16                       # N not a multiple of 8: exercises padding
    key = jax.random.PRNGKey(0)
    k1, k2, k3, k4 = jax.random.split(key, 4)

    logits = jax.random.normal(k1, (N, C), dtype=jnp.float32) * 3.0
    target = jax.random.randint(k2, (N,), 0, C, dtype=jnp.int32)
    prev_passed = jax.random.bernoulli(k3, 0.3, (N,))

    # deterministic synthetic parameters (module __init__ args):
    #   class_weights: (C, C) positive cost matrix (rows indexed by super class)
    #   super_classes: (C,) fine-class -> super-class map, stored as float
    class_weights = 1.0 + jax.random.uniform(k4, (C, C), dtype=jnp.float32)
    super_classes = (jnp.arange(C, dtype=jnp.int32) // 2).astype(jnp.float32)
    threshold = 2.0

    loss, next_passed = cost_adjusted_cel_samples(
        logits, target, prev_passed, class_weights, super_classes, threshold)
    jax.block_until_ready((loss, next_passed))

    ref_loss, ref_next = _reference(
        logits, target, prev_passed, class_weights, super_classes, threshold)
    assert jnp.allclose(loss, ref_loss, rtol=1e-5, atol=1e-5), (loss, ref_loss)
    assert bool(jnp.all(next_passed == ref_next))

    print("KERNEL_OK")
</pallas_src>

<mosaic_0001>
module attributes {stable_mosaic.version = 11 : i64} {
  func.func @_cel_kernel(%arg0: i32, %arg1: memref<16x16xf32, #tpu.memory_space<vmem>>, %arg2: memref<16x16xf32, #tpu.memory_space<vmem>>, %arg3: memref<16x2xi32, #tpu.memory_space<vmem>>, %arg4: memref<1x1x128xf32, #tpu.memory_space<vmem>>, %arg5: memref<16x1xi32, #tpu.memory_space<vmem>>) attributes {dimension_semantics = [#tpu.dimension_semantics<parallel>], iteration_bounds = array<i64: 1>, scalar_prefetch = 0 : i64, scratch_operands = 0 : i64, tpu.core_type = #tpu.core_type<tc>, window_params = [{transform_indices = @transform_0, window_bounds = array<i64: 16, 16>}, {pipeline_mode = #tpu.pipeline_mode<synchronous>, transform_indices = @transform_1, window_bounds = array<i64: 16, 16>}, {transform_indices = @transform_2, window_bounds = array<i64: 16, 2>}, {transform_indices = @transform_3, window_bounds = array<i64: 1, 1, 128>}, {transform_indices = @transform_4, window_bounds = array<i64: 16, 1>}]} {
    %c0 = arith.constant 0 : index
    %c0_0 = arith.constant 0 : index
    %0 = vector.load %arg1[%c0, %c0_0] : memref<16x16xf32, #tpu.memory_space<vmem>>, vector<16x16xf32>
    %c0_1 = arith.constant 0 : index
    %c0_2 = arith.constant 0 : index
    %1 = vector.load %arg3[%c0_1, %c0_2] : memref<16x2xi32, #tpu.memory_space<vmem>>, vector<16x2xi32>
    %2 = vector.extract_strided_slice %1 {offsets = [0, 0], sizes = [16, 1], strides = [1, 1]} : vector<16x2xi32> to vector<16x1xi32>
    %3 = vector.extract_strided_slice %1 {offsets = [0, 1], sizes = [16, 1], strides = [1, 1]} : vector<16x2xi32> to vector<16x1xi32>
    %cst = arith.constant dense<0xFF800000> : vector<16xf32>
    %4 = vector.multi_reduction <maximumf>, %0, %cst [1] : vector<16x16xf32> to vector<16xf32>
    %5 = vector.shape_cast %4 : vector<16xf32> to vector<16x1xf32>
    %6 = vector.broadcast %5 : vector<16x1xf32> to vector<16x16xf32>
    %7 = arith.subf %0, %6 : vector<16x16xf32>
    %8 = math.exp %7 : vector<16x16xf32>
    %cst_3 = arith.constant dense<0.000000e+00> : vector<16xf32>
    %9 = vector.multi_reduction <add>, %8, %cst_3 [1] : vector<16x16xf32> to vector<16xf32>
    %10 = vector.shape_cast %9 : vector<16xf32> to vector<16x1xf32>
    %11 = math.log %10 : vector<16x1xf32>
    %12 = arith.mulf %8, %7 : vector<16x16xf32>
    %cst_4 = arith.constant dense<0.000000e+00> : vector<16xf32>
    %13 = vector.multi_reduction <add>, %12, %cst_4 [1] : vector<16x16xf32> to vector<16xf32>
    %14 = vector.shape_cast %13 : vector<16xf32> to vector<16x1xf32>
    %cst_5 = arith.constant 2.000000e+00 : f32
    %15 = vector.broadcast %cst_5 : f32 to vector<16x1xf32>
    %16 = arith.subf %11, %15 : vector<16x1xf32>
    %17 = arith.mulf %16, %10 : vector<16x1xf32>
    %18 = arith.cmpf olt, %17, %14 : vector<16x1xf32>
    %c0_i32 = arith.constant 0 : i32
    %19 = vector.broadcast %c0_i32 : i32 to vector<16x1xi32>
    %20 = arith.cmpi ne, %3, %19 : vector<16x1xi32>
    %21 = arith.sitofp %3 : vector<16x1xi32> to vector<16x1xf32>
    %cst_6 = arith.constant 1.000000e+00 : f32
    %22 = vector.broadcast %cst_6 : f32 to vector<16x1xf32>
    %23 = arith.subf %22, %21 : vector<16x1xf32>
    %24 = arith.ori %18, %20 : vector<16x1xi1>
    %25 = arith.extui %24 : vector<16x1xi1> to vector<16x1xi32>
    %c0_7 = arith.constant 0 : index
    %c0_8 = arith.constant 0 : index
    %26 = vector.load %arg5[%c0_7, %c0_8] : memref<16x1xi32, #tpu.memory_space<vmem>>, vector<16x1xi32>
    tpu.vector_store %arg5[%c0_7, %c0_8], %25 {strides = array<i32>} : memref<16x1xi32, #tpu.memory_space<vmem>>, vector<16x1xi32>,
    %27 = tpu.iota {dimensions = array<i32: 1>} : vector<16x16xi32>
    %cst_9 = arith.constant 0.000000e+00 : f32
    %28 = vector.broadcast %cst_9 : f32 to vector<16x16xf32>
    %29 = arith.cmpf oeq, %7, %28 : vector<16x16xf32>
    %c16_i32 = arith.constant 16 : i32
    %30 = vector.broadcast %c16_i32 : i32 to vector<16x16xi32>
    %31 = arith.select %29, %27, %30 : vector<16x16xi1>, vector<16x16xi32>
    %cst_10 = arith.constant dense<2147483647> : vector<16xi32>
    %32 = vector.multi_reduction <minsi>, %31, %cst_10 [1] : vector<16x16xi32> to vector<16xi32>
    %33 = vector.shape_cast %32 : vector<16xi32> to vector<16x1xi32>
    %34 = vector.broadcast %33 : vector<16x1xi32> to vector<16x16xi32>
    %35 = arith.cmpi eq, %27, %34 : vector<16x16xi32>
    %36 = arith.extui %35 : vector<16x16xi1> to vector<16x16xi32>
    %37 = arith.sitofp %36 : vector<16x16xi32> to vector<16x16xf32>
    %c0_11 = arith.constant 0 : index
    %c0_12 = arith.constant 0 : index
    %38 = vector.load %arg2[%c0_11, %c0_12] : memref<16x16xf32, #tpu.memory_space<vmem>>, vector<16x16xf32>
    %cst_13 = arith.constant dense<0.000000e+00> : vector<16x16xf32>
    %39 = tpu.matmul %37, %38, %cst_13 {dimension_numbers = #tpu.dot_dimension_numbers<[1], [0], [0], [1], [0, 0, 1, 1], [], []>} : vector<16x16xf32>, vector<16x16xf32>, vector<16x16xf32> -> vector<16x16xf32>
    %40 = tpu.iota {dimensions = array<i32: 1>} : vector<16x16xi32>
    %41 = vector.broadcast %2 : vector<16x1xi32> to vector<16x16xi32>
    %42 = arith.cmpi eq, %40, %41 : vector<16x16xi32>
    %cst_14 = arith.constant 0.000000e+00 : f32
    %43 = vector.broadcast %cst_14 : f32 to vector<16x16xf32>
    %44 = arith.select %42, %39, %43 : vector<16x16xi1>, vector<16x16xf32>
    %cst_15 = arith.constant dense<0.000000e+00> : vector<16xf32>
    %45 = vector.multi_reduction <add>, %44, %cst_15 [1] : vector<16x16xf32> to vector<16xf32>
    %46 = vector.shape_cast %45 : vector<16xf32> to vector<16x1xf32>
    %47 = arith.mulf %46, %23 : vector<16x1xf32>
    %48 = vector.broadcast %2 : vector<16x1xi32> to vector<16x16xi32>
    %49 = arith.cmpi eq, %27, %48 : vector<16x16xi32>
    %cst_16 = arith.constant 0.000000e+00 : f32
    %50 = vector.broadcast %cst_16 : f32 to vector<16x16xf32>
    %51 = arith.select %49, %7, %50 : vector<16x16xi1>, vector<16x16xf32>
    %cst_17 = arith.constant dense<0.000000e+00> : vector<16xf32>
    %52 = vector.multi_reduction <add>, %51, %cst_17 [1] : vector<16x16xf32> to vector<16xf32>
    %53 = vector.shape_cast %52 : vector<16xf32> to vector<16x1xf32>
    %54 = arith.subf %53, %11 : vector<16x1xf32>
    %cst_18 = arith.constant 0.000000e+00 : f32
    %55 = vector.broadcast %cst_18 : f32 to vector<16x1xf32>
    %56 = arith.subf %55, %47 : vector<16x1xf32>
    %57 = arith.mulf %56, %54 : vector<16x1xf32>
    %58 = vector.shape_cast %57 : vector<16x1xf32> to vector<1x16x1xf32>
    %cst_19 = arith.constant dense<0.000000e+00> : vector<1xf32>
    %59 = vector.multi_reduction <add>, %58, %cst_19 [1, 2] : vector<1x16x1xf32> to vector<1xf32>
    %60 = vector.shape_cast %59 : vector<1xf32> to vector<1x1x1xf32>
    %61 = vector.extract %60[0, 0, 0] : f32 from vector<1x1x1xf32>
    %62 = vector.shape_cast %47 : vector<16x1xf32> to vector<1x16x1xf32>
    %cst_20 = arith.constant dense<0.000000e+00> : vector<1xf32>
    %63 = vector.multi_reduction <add>, %62, %cst_20 [1, 2] : vector<1x16x1xf32> to vector<1xf32>
    %64 = vector.shape_cast %63 : vector<1xf32> to vector<1x1x1xf32>
    %65 = vector.extract %64[0, 0, 0] : f32 from vector<1x1x1xf32>
    %66 = vector.shape_cast %23 : vector<16x1xf32> to vector<1x16x1xf32>
    %cst_21 = arith.constant dense<0.000000e+00> : vector<1xf32>
    %67 = vector.multi_reduction <add>, %66, %cst_21 [1, 2] : vector<1x16x1xf32> to vector<1xf32>
    %68 = vector.shape_cast %67 : vector<1xf32> to vector<1x1x1xf32>
    %69 = vector.extract %68[0, 0, 0] : f32 from vector<1x1x1xf32>
    %70 = tpu.iota {dimensions = array<i32: 2>} : vector<1x1x128xi32>
    %c0_i32_22 = arith.constant 0 : i32
    %71 = vector.broadcast %c0_i32_22 : i32 to vector<1x1x128xi32>
    %72 = arith.cmpi eq, %70, %71 : vector<1x1x128xi32>
    %c1_i32 = arith.constant 1 : i32
    %73 = vector.broadcast %c1_i32 : i32 to vector<1x1x128xi32>
    %74 = arith.cmpi eq, %70, %73 : vector<1x1x128xi32>
    %c2_i32 = arith.constant 2 : i32
    %75 = vector.broadcast %c2_i32 : i32 to vector<1x1x128xi32>
    %76 = arith.cmpi eq, %70, %75 : vector<1x1x128xi32>
    %cst_23 = arith.constant 0.000000e+00 : f32
    %77 = vector.broadcast %69 : f32 to vector<1x1x128xf32>
    %78 = vector.broadcast %cst_23 : f32 to vector<1x1x128xf32>
    %79 = arith.select %76, %77, %78 : vector<1x1x128xi1>, vector<1x1x128xf32>
    %80 = vector.broadcast %65 : f32 to vector<1x1x128xf32>
    %81 = arith.select %74, %80, %79 : vector<1x1x128xi1>, vector<1x1x128xf32>
    %82 = vector.broadcast %61 : f32 to vector<1x1x128xf32>
    %83 = arith.select %72, %82, %81 : vector<1x1x128xi1>, vector<1x1x128xf32>
    %c0_24 = arith.constant 0 : index
    %c0_25 = arith.constant 0 : index
    %c0_26 = arith.constant 0 : index
    %84 = vector.load %arg4[%c0_24, %c0_25, %c0_26] : memref<1x1x128xf32, #tpu.memory_space<vmem>>, vector<1x1x128xf32>
    tpu.vector_store %arg4[%c0_24, %c0_25, %c0_26], %83 {strides = array<i32>} : memref<1x1x128xf32, #tpu.memory_space<vmem>>, vector<1x1x128xf32>,
    return
  }
  func.func @transform_0(%arg0: i32) -> (i32, i32) {
    %c0_i32 = arith.constant 0 : i32
    %c0_i32_0 = arith.constant 0 : i32
    return %arg0, %c0_i32 : i32, i32
  }
  func.func @transform_1(%arg0: i32) -> (i32, i32) {
    %c0_i32 = arith.constant 0 : i32
    %c0_i32_0 = arith.constant 0 : i32
    %c0_i32_1 = arith.constant 0 : i32
    return %c0_i32, %c0_i32_0 : i32, i32
  }
  func.func @transform_2(%arg0: i32) -> (i32, i32) {
    %c0_i32 = arith.constant 0 : i32
    %c0_i32_0 = arith.constant 0 : i32
    return %arg0, %c0_i32 : i32, i32
  }
  func.func @transform_3(%arg0: i32) -> (i32, i32, i32) {
    %c0_i32 = arith.constant 0 : i32
    %c0_i32_0 = arith.constant 0 : i32
    %c0_i32_1 = arith.constant 0 : i32
    return %arg0, %c0_i32, %c0_i32_0 : i32, i32, i32
  }
  func.func @transform_4(%arg0: i32) -> (i32, i32) {
    %c0_i32 = arith.constant 0 : i32
    %c0_i32_0 = arith.constant 0 : i32
    return %arg0, %c0_i32 : i32, i32
  }
}

</mosaic_0001>

<bundles_post_ra>
// kernel: tpu_custom_call.1
= control target key start
LH: loop header
LB: loop body
LE: loop exit
PB: predicated region body
PF: predicated region fallthrough
CT: control target
= control target key end

     0   :  { %10 = vsyncpa [#allocation3], 0  ;;  %s558_s0 = inlined_call_operand.vmem [shape: f32[16,16], index: 0, kind: input, shape index: {}]   ;;  %s559_s1 = inlined_call_operand.hbm [shape: f32[16,16], index: 1, kind: input, shape index: {}]   ;;  %s560_s2 = inlined_call_operand.vmem [shape: s32[16,2], index: 2, kind: input, shape index: {}]   ;;  %s561_s3 = inlined_call_operand.hbm [shape: f32[1,1,128], index: 3, kind: output, shape index: {0}]   ;;  %s562_s4 = inlined_call_operand.vmem [shape: s32[16,1], index: 4, kind: output, shape index: {1}]  }
   0x1   :  { %11 = vsyncpa [#allocation4], 0  ;;  %s419_s15 = smov [#allocation2]  }
   0x2   :  { %s19_s16 = sshll.u32 %s419_s15, 4  ;;  %s20_s16 = int_to_ptr.vmem [resolvable:$true] %s19_s16 }
   0x3   :  { %s383_s17 = scalar_lea.vmem %s20_s16, 256  ;;  %p388_p1 = scmp.lt.s32.totalorder %s20_s16, %s20_s16 }
   0x4   :  { %p384_p0 = scmp.ne.s32.totalorder %s20_s16, %s383_s17  ;;  %p389_p2 = scmp.lt.s32.totalorder %s383_s17, %s383_s17 }
   0x6   :  { %p390_p3 = por %p389_p2, %p388_p1 }
   0x8   :  { %p391_p4 = pnand %p390_p3, %p384_p0 }
   0xa   :  { %394 = shalt.err (!%p391_p4)
}
   0xb   :  { %s420_s18 = smov 128   ;;  %s421_s19 = smov 8  }
   0xc   :  { %25 = dma.hbm_to_vmem [thread:$0]  %s559_s1, 256, %s20_s16, [#allocation3], %s420_s18, %s420_s18, %s421_s19  }
   0xd   :  { %415 = dma.done.wait [#allocation3], 256  }
   0xe   :  { %416 = vsyncadd [#allocation3], 4294967040  ;;  %vm35_vm0 = vcmask 130048   ;;  %v31_v0 = vld [vmem:[%s558_s0] sm:$0xff]  ;;  %v32_v1 = vld [vmem:[%s558_s0 + $0x8] sm:$0xff]  ;;  %v89_v4 = vlaneseq  ;;  %v422_v18 = vmov 0  }
   0xf   :  { %v36_v2 = vsel %vm35_vm0, %v31_v0, -inf  ;;  %v39_v3 = vsel %vm35_vm0, %v32_v1, -inf  ;;  %366 = vset.pattern.permute.xlu1 %v422_v18  ;;  %365 = vset.pattern.permute.xlu0 %v422_v18  ;;  %v132_v27 = vld [vmem:[#allocation2 + $0x8] sm:$0xff]  ;;  %v131_v28 = vld [vmem:[#allocation2] sm:$0xff]  ;;  %v423_v46 = vmov 0.0   ;;  %vm86_vm9 = vcmask 7168  }
  0x10   :  { %37 = vmax.xlane.f32.xlu0 %v36_v2  ;;  %v462_v6 = vand.u32 127, %v89_v4  ;;  %345 = vmatprep.subr.mxu0 %v132_v27  ;;  %v479_v29 = vld [vmem:[%s560_s2 + $0x8] sm:$0xff]  ;;  %v484_v30 = vld [vmem:[%s560_s2] sm:$0xff]  ;;  %s424_s2 = smov 127   ;;  %s425_s5 = smov [#allocation5]  }
  0x11   :  { %346 = vmatpush3.msra.mxu0 %v132_v27  ;;  %vm72_vm10 = vcmp.ne.s32.totalorder %v484_v30, 0  ;;  %vm73_vm13 = vcmp.ne.s32.totalorder %v479_v29, 0  ;;  %s322_s6 = sshll.u32 %s425_s5, 4  ;;  %s323_s6 = int_to_ptr.vmem [resolvable:$true] %s322_s6 }
  0x12   :  { %347 = vmatprep.subr.mxu0 %v131_v28  ;;  %s395_s7 = scalar_lea.vmem %s323_s6, 16  ;;  %s399_s8 = scalar_lea.vmem %s323_s6, 32 }
  0x13   :  { %348 = vmatpush3.msra.mxu0 %v131_v28  ;;  %p396_p5 = scmp.ne.s32.totalorder %s323_s6, %s395_s7  ;;  %p400_p6 = scmp.lt.s32.totalorder %s323_s6, %s323_s6 }
  0x14   :  { %40 = vmax.xlane.f32.xlu0 %v39_v3  ;;  %v74_v3 = vcvt.s32.f32 %v484_v30  ;;  %p401_p7 = scmp.lt.s32.totalorder %s399_s8, %s395_s7 }
  0x16   :  { %p402_p8 = por %p401_p7, %p400_p6 }
  0x18   :  { %p403_p9 = pnand %p402_p8, %p396_p5 }
  0x99   :  { %v38_v5 = vpop.xlane.xlu0 %37 }
  0x9a   :  { %v464_v7 = vsub.f32 %v31_v0, %v38_v5  ;;  %v75_v0 = vcvt.s32.f32 %v479_v29 }
  0x9c   :  { %vm91_vm1 = vcmp.eq.f32.partialorder %v464_v7, 0.0  ;;  %v44_v32 = vmul.f32 1.442695, %v464_v7  ;;  %v77_v2 = vsub.f32 1.0, %v75_v0 }
  0x9d   :  { %v41_v8 = vpop.xlane.xlu0 %40  ;;  %v93_v9 = vsel %vm91_vm1, %v462_v6, 16  ;;  %vm307_vm1 = vcmp.eq.s32.totalorder %v462_v6, 1 }
  0x9e   :  { %v468_v10 = vsub.f32 %v32_v1, %v41_v8  ;;  %v95_v11 = vsel %vm35_vm0, %v93_v9, 2147483647  ;;  %v76_v8 = vsub.f32 1.0, %v74_v3 }
  0x9f   :  { %v97_v12 = vshra.s32 %v95_v11, 16  ;;  %v96_v19 = vand.u32 65535, %v95_v11 }
  0xa0   :  { %vm92_vm2 = vcmp.eq.f32.partialorder %v468_v10, 0.0  ;;  %v46_v31 = vmul.f32 1.442695, %v468_v10 }
  0xa1   :  { %v99_v13 = vcvt.s32.f32 %v97_v12  ;;  %v94_v14 = vsel %vm92_vm2, %v462_v6, 16  ;;  %v98_v21 = vcvt.s32.f32 %v96_v19  ;;  %vm306_vm2 = vcmp.eq.s32.totalorder %v462_v6, 0 }
  0xa2   :  { %v110_v15 = vsel %vm35_vm0, %v94_v14, 2147483647  ;;  %367 = vpow2.f32 %v46_v31 }
  0xa3   :  { %100 = vmin.xlane.f32.xlu1 %v99_v13  ;;  %v112_v16 = vshra.s32 %v110_v15, 16  ;;  %v111_v22 = vand.u32 65535, %v110_v15  ;;  %369 = vpow2.f32 %v44_v32 }
  0xa5   :  { %v114_v17 = vcvt.s32.f32 %v112_v16  ;;  %v113_v25 = vcvt.s32.f32 %v111_v22 }
  0xa7   :  { %115 = vmin.xlane.f32.xlu1 %v114_v17 }
  0xaf   :  { %v490_v33 = vpop.eup %367 }
  0xb0   :  { %v51_v34 = vsel %vm35_vm0, %v490_v33, 0.0  ;;  %v494_v35 = vpop.eup %369 }
  0xb1   :  { %v48_v36 = vsel %vm35_vm0, %v494_v35, 0.0 }
 0x12c   :  { %v101_v20 = vpop.xlane.xlu1 %100 }
 0x12d   :  { %vm102_vm3 = vcmp.eq.f32.partialorder %v99_v13, %v101_v20  ;;  %v107_v37 = vcvt.f32.s32 %v101_v20 }
 0x12e   :  { %v103_v23 = vsel %vm102_vm3, %v98_v21, inf }
 0x12f   :  { %104 = vmin.xlane.f32.xlu0 %v103_v23  ;;  %v108_v39 = vshll.u32 %v107_v37, 16 }
 0x130   :  { %v116_v24 = vpop.xlane.xlu1 %115 }
 0x131   :  { %vm117_vm4 = vcmp.eq.f32.partialorder %v114_v17, %v116_v24  ;;  %v122_v40 = vcvt.f32.s32 %v116_v24 }
 0x132   :  { %v118_v26 = vsel %vm117_vm4, %v113_v25, inf }
 0x133   :  { %119 = vmin.xlane.f32.xlu1 %v118_v26  ;;  %v123_v44 = vshll.u32 %v122_v40, 16  ;;  %v58_v40 = vmul.f32 %v494_v35, %v464_v7 }
 0x144   :  { %218 = vperm.xlu1 %366, %v479_v29  }
 0x145   :  { %215 = vperm.xlu0 %365, %v484_v30  }
 0x164   :  { %52 = vadd.xlane.f32.xlu0 %v51_v34 }
 0x168   :  { %49 = vadd.xlane.f32.xlu1 %v48_v36 }
 0x1b8   :  { %v105_v38 = vpop.xlane.xlu0 %104 }
 0x1b9   :  { %v106_v41 = vcvt.f32.s32 %v105_v38 }
 0x1bb   :  { %v109_v42 = vadd.s32 %v108_v39, %v106_v41 }
 0x1bc   :  { %v120_v43 = vpop.xlane.xlu1 %119 }
 0x1bd   :  { %v121_v45 = vcvt.f32.s32 %v120_v43  ;;  %vm125_vm5 = vcmp.eq.s32.totalorder %v462_v6, %v109_v42 }
 0x1be   :  { %v337_v47 = vsel %vm125_vm5, 1.0, %v423_v46 }
 0x1bf   :  { %v124_v48 = vadd.s32 %v123_v44, %v121_v45  ;;  %349 = vmatprep.mubr.msk.f32.mxu0 %vm35_vm0, %v337_v47  ;;  %v60_v44 = vsel %vm35_vm0, %v58_v40, 0.0  ;;  %v59_v45 = vmul.f32 %v490_v33, %v468_v10 }
 0x1c0   :  { %v216_v49 = vpop.permute.xlu0 %215  ;;  %v219_v53 = vpop.permute.xlu1 %218 }
 0x1c1   :  { %vm126_vm6 = vcmp.eq.s32.totalorder %v462_v6, %v124_v48  ;;  %vm220_vm7 = vcmp.eq.s32.totalorder %v462_v6, %v216_v49  ;;  %vm221_vm8 = vcmp.eq.s32.totalorder %v462_v6, %v219_v53 }
 0x1c2   :  { %v338_v50 = vsel %vm126_vm6, 1.0, %v423_v46  ;;  %v232_v51 = vsel %vm220_vm7, %v464_v7, 0.0  ;;  %v233_v60 = vsel %vm221_vm8, %v468_v10, 0.0  ;;  %v63_v46 = vsel %vm35_vm0, %v59_v45, 0.0 }
 0x1c3   :  { %350 = vmatmul.mubr.msk.f32.vlgmr.msra.gmra.mxu0 %vm35_vm0, %v338_v50  ;;  %v234_v52 = vsel %vm35_vm0, %v232_v51, 0.0  ;;  %v237_v61 = vsel %vm35_vm0, %v233_v60, 0.0 }
 0x1c4   :  { %235 = vadd.xlane.f32.xlu1 %v234_v52 }
 0x1ed   :  { %v512_v63 = vpop.xlane.xlu0 %52 }
 0x1f1   :  { %v510_v62 = vpop.xlane.xlu1 %49 }
 0x1f2   :  { %371 = vlog2.f32 %v510_v62 }
 0x1f3   :  { %373 = vlog2.f32 %v512_v63 }
 0x1ff   :  { %v372_v9 = vpop.eup %371 }
 0x200   :  { %v374_v11 = vpop.eup %373  ;;  %v55_v13 = vmul.f32 0.6931472, %v372_v9 }
 0x201   :  { %v57_v15 = vmul.f32 0.6931472, %v374_v11 }
 0x202   :  { %v335_v50 = vadd.f32 -2.0, %v55_v13 }
 0x203   :  { %v336_v52 = vadd.f32 -2.0, %v57_v15 }
 0x204   :  { %v68_v53 = vmul.f32 %v335_v50, %v510_v62 }
 0x24d   :  { %v236_v1 = vpop.xlane.xlu1 %235 }
 0x24e   :  { %v240_v16 = vsub.f32 %v236_v1, %v55_v13 }
 0x283   :  { %v351_v54 = vpop.f32.mrf.mxu0 }
 0x284   :  { %v223_v55 = vsel %vm221_vm8, %v351_v54, 0.0 }
 0x285   :  { %v205_v56 = vpop.f32.mrf.mxu0  ;;  %v227_v57 = vsel %vm35_vm0, %v223_v55, 0.0 }
 0x286   :  { %v222_v58 = vsel %vm220_vm7, %v205_v56, 0.0  ;;  %228 = vadd.xlane.f32.xlu1 %v227_v57 }
 0x287   :  { %v224_v59 = vsel %vm35_vm0, %v222_v58, 0.0  ;;  %v69_v58 = vmul.f32 %v336_v52, %v512_v63  ;;  %vm308_vm0 = vcmp.eq.s32.totalorder %v462_v6, 2 }
 0x28a   :  { %225 = vadd.xlane.f32.xlu1 %v224_v59 }
 0x28e   :  { %238 = vadd.xlane.f32.xlu1 %v237_v61 }
 0x30f   :  { %v229_v4 = vpop.xlane.xlu1 %228 }
 0x310   :  { %v231_v5 = vmul.f32 %v229_v4, %v77_v2 }
 0x312   :  { %270 = vrot.lane.b32.xlu1 %v231_v5, %s424_s2  ;;  %v243_v20 = vsub.f32 0.0, %v231_v5 }
 0x313   :  { %v226_v12 = vpop.xlane.xlu1 %225 }
 0x314   :  { %v230_v14 = vmul.f32 %v226_v12, %v76_v8 }
 0x316   :  { %v242_v17 = vsub.f32 0.0, %v230_v14  ;;  %268 = vrot.lane.b32.xlu1 %v230_v14, %s424_s2 }
 0x317   :  { %v239_v19 = vpop.xlane.xlu1 %238 }
 0x318   :  { %v241_v21 = vsub.f32 %v239_v19, %v57_v15  ;;  %v244_v22 = vmul.f32 %v242_v17, %v240_v16 }
 0x31a   :  { %v245_v23 = vmul.f32 %v243_v20, %v241_v21  ;;  %248 = vrot.lane.b32.xlu1 %v244_v22, %s424_s2 }
 0x31c   :  { %250 = vrot.lane.b32.xlu0 %v245_v23, %s424_s2 }
 0x31e   :  { %288 = vrot.lane.b32.xlu1 %v76_v8, %s424_s2 }
 0x320   :  { %290 = vrot.lane.b32.xlu0 %v77_v2, %s424_s2 }
 0x384   :  { %v271_v24 = vpop.permute.xlu1 %270 }
 0x385   :  { %v275_v26 = vsel %vm86_vm9, %v271_v24, 0.0 }
 0x388   :  { %v269_v25 = vpop.permute.xlu1 %268 }
 0x389   :  { %v274_v27 = vsel %vm86_vm9, %v269_v25, 0.0 }
 0x38a   :  { %v276_v28 = vadd.f32 %v275_v26, %v274_v27 }
 0x38c   :  { %v249_v31 = vpop.permute.xlu1 %248  ;;  %277 = vadd.xlane.f32.xlu0 %v276_v28 }
 0x38d   :  { %v254_v34 = vsel %vm86_vm9, %v249_v31, 0.0 }
 0x38e   :  { %v251_v32 = vpop.permute.xlu0 %250 }
 0x38f   :  { %v255_v36 = vsel %vm86_vm9, %v251_v32, 0.0 }
 0x390   :  { %v289_v37 = vpop.permute.xlu1 %288  ;;  %v256_v38 = vadd.f32 %v255_v36, %v254_v34 }
 0x391   :  { %v294_v39 = vsel %vm86_vm9, %v289_v37, 0.0 }
 0x392   :  { %257 = vadd.xlane.f32.xlu1 %v256_v38  ;;  %v291_v41 = vpop.permute.xlu0 %290 }
 0x393   :  { %v295_v42 = vsel %vm86_vm9, %v291_v41, 0.0 }
 0x394   :  { %v296_v43 = vadd.f32 %v295_v42, %v294_v39 }
 0x396   :  { %61 = vadd.xlane.f32.xlu1 %v60_v44  ;;  %297 = vadd.xlane.f32.xlu0 %v296_v43 }
 0x39a   :  { %64 = vadd.xlane.f32.xlu0 %v63_v46 }
 0x415   :  { %v278_v47 = vpop.xlane.xlu0 %277 }
 0x416   :  { %v279_v48 = vrot.slane %v278_v47, 4 }
 0x418   :  { %v280_v49 = vadd.f32 %v279_v48, %v278_v47 }
 0x41a   :  { %v281_v7 = vrot.slane %v280_v49, 2 }
 0x41b   :  { %v258_v35 = vpop.xlane.xlu1 %257 }
 0x41c   :  { %v259_v51 = vrot.slane %v258_v35, 4  ;;  %v282_v33 = vadd.f32 %v281_v7, %v280_v49 }
 0x41e   :  { %v260_v54 = vadd.f32 %v259_v51, %v258_v35  ;;  %v283_v0 = vrot.slane %v282_v33, 1 }
 0x41f   :  { %v62_v55 = vpop.xlane.xlu1 %61  ;;  %v298_v10 = vpop.xlane.xlu0 %297 }
 0x420   :  { %v261_v56 = vrot.slane %v260_v54, 2  ;;  %vm70_vm11 = vcmp.lt.f32.partialorder %v68_v53, %v62_v55  ;;  %v299_v57 = vrot.slane %v298_v10, 4  ;;  %v284_v63 = vadd.f32 %v283_v0, %v282_v33 }
 0x421   :  { %vm78_vm12 = vmor %vm70_vm11, %vm72_vm10 }
 0x422   :  { %v300_v59 = vadd.f32 %v299_v57, %v298_v10  ;;  %v80_v60 = vsel %vm78_vm12, 1, %v422_v18  ;;  %v262_v61 = vadd.f32 %v261_v56, %v260_v54 }
 0x423   :  { %82 = vrot.lane.b32.xlu1 %v80_v60, %s424_s2  ;;  %v65_v62 = vpop.xlane.xlu0 %64 }
 0x424   :  { %v301_v30 = vrot.slane %v300_v59, 2  ;;  %vm71_vm14 = vcmp.lt.f32.partialorder %v69_v58, %v65_v62  ;;  %v263_v1 = vrot.slane %v262_v61, 1 }
 0x425   :  { %vm79_vm15 = vmor %vm71_vm14, %vm73_vm13 }
 0x426   :  { %v81_v2 = vsel %vm79_vm15, 1, %v422_v18  ;;  %v264_v3 = vadd.f32 %v263_v1, %v262_v61  ;;  %v302_v4 = vadd.f32 %v301_v30, %v300_v59 }
 0x427   :  { %84 = vrot.lane.b32.xlu0 %v81_v2, %s424_s2 }
 0x428   :  { %352 = vpush %v264_v3  ;;  %v303_v5 = vrot.slane %v302_v4, 1 }
 0x429   :  { %354 = vpush %v284_v63 }
 0x42a   :  { %v304_v29 = vadd.f32 %v303_v5, %v302_v4 }
 0x42c   :  { %356 = vpush %v304_v29 }
 0x459   :  { %s353_s28 = spop %352 }
 0x45a   :  { %s355_s29 = spop %354  ;;  %v313_v11 = vstv %s353_s28 }
 0x45b   :  { %v311_v8 = vstv %s355_s29 }
 0x45d   :  { %s357_s30 = spop %356 }
 0x45e   :  { %v309_v18 = vstv %s357_s30 }
 0x45f   :  { %v310_v9 = vsel %vm308_vm0, %v309_v18, 0.0 }
 0x460   :  { %v312_v12 = vsel %vm307_vm1, %v311_v8, %v310_v9 }
 0x461   :  { %v314_v13 = vsel %vm306_vm2, %v313_v11, %v312_v12 }
 0x462   :  { %315 = vst [vmem:[#allocation5] sm:$0x1] %v314_v13 }
 0x463   :  { %406 = shalt.err (!%p403_p9)
}
 0x464   :  { %325 = dma.vmem_to_hbm [thread:$0]  %s323_s6, 16, %s561_s3, [#allocation4]  }
 0x495   :  { %v83_v6 = vpop.permute.xlu1 %82 }
 0x496   :  { %87 = vst.msk [vmem:[%s562_s4] sm:$0xff] %vm86_vm9, %v83_v6 }
 0x499   :  { %v85_v14 = vpop.permute.xlu0 %84 }
 0x49a   :  { %88 = vst.msk [vmem:[%s562_s4 + $0x8] sm:$0xff] %vm86_vm9, %v85_v14 }
 0x49b   :  { %417 = dma.done.wait [#allocation4], 16  }
 0x49c   :  { %418 = vsyncadd [#allocation4], 4294967280 }
 0x49d   :  { %333 = vsyncpa [#allocation3], 1 }
 0x49e   :  { %334 = vsyncpa [#allocation4], 1 }

</bundles_post_ra>
